<compile_context>
chip_gen: v5e
topology: v5e:2x2
jax: 0.10.0
libtpu: 0.0.40
codegen_flags: <defaults>
</compile_context>

<pallas_src>
import functools

import jax
import jax.numpy as jnp
from jax.experimental import pallas as pl
from jax.experimental.pallas import tpu as pltpu


_LANE = 128
_TARGET_STEP_BYTES = 8 * 1024 * 1024   # aim for >= ~8 MiB of input per grid step
_BASE_ROW_CAP = 1024                   # measured 85-86%-of-roofline plateau


def _sublane_align(*dtypes):
    """Row-tile alignment: 8 for 32-bit, 16 for 16-bit, 32 for 8-bit dtypes."""
    align = 8
    for dt in dtypes:
        bits = jnp.dtype(dt).itemsize * 8
        align = max(align, 256 // max(bits, 1))
    return align


def _vmem_caps():
    """(tile_budget_bytes, scoped_vmem_limit_bytes), generation aware."""
    cap = None
    try:
        cap = int(getattr(pltpu.get_tpu_info(), "vmem_capacity_bytes", 0)) or None
    except Exception:
        cap = None
    if cap is None:
        cap = 64 * 1024 * 1024          # v7x-safe fallback (64 MiB per TC)
    limit = max(cap - 16 * 1024 * 1024, 32 * 1024 * 1024)
    budget = max(cap - 32 * 1024 * 1024, 24 * 1024 * 1024)
    budget = min(budget, limit - 8 * 1024 * 1024)
    return budget, limit


def _choose_row_tile(rows, width, in_dtype, out_dtype, vmem_budget):
    """Largest aligned rows-per-step whose VMEM footprint fits the budget."""
    align = _sublane_align(in_dtype, out_dtype)
    in_b = jnp.dtype(in_dtype).itemsize
    out_b = jnp.dtype(out_dtype).itemsize
    # Double-buffered in/out tiles + up to 3 f32-sized live temporaries per row
    # (x_f32, centered x, pre-cast y) — conservative so v7x doesn't spill.
    per_row = width * (2 * in_b + 2 * out_b + 3 * 4)
    tr = max(vmem_budget // max(per_row, 1), align)
    # Bytes-per-step floor: for small hidden, raise the row cap until each
    # input tile reaches ~_TARGET_STEP_BYTES (amortizes ~0.35 us/step).
    rows_for_target = -(-_TARGET_STEP_BYTES // max(width * in_b, 1))
    tr = min(tr, max(_BASE_ROW_CAP, rows_for_target))
    tr = max((tr // align) * align, align)

    if tr < rows:
        return tr

    # Whole array fits in one step: split it so the "parallel" row axis gives
    # both v7x TensorCores work (>=4 steps if big enough, else 2), unless tiny.
    total_bytes = rows * width * in_b
    if rows >= 4 * align and total_bytes >= 2 * 1024 * 1024:
        steps = 4
    elif rows >= 2 * align and total_bytes >= 1 * 1024 * 1024:
        steps = 2
    else:
        return rows                      # single full-extent block
    rows_rounded = ((rows + align - 1) // align) * align
    return align * max(rows_rounded // (steps * align), 1)


def _ln_body(x_ref, m_ref, w_ref, b_ref, o_ref, eps, seg):
    """Shared LayerNorm body.

    m_ref is None  -> reduce over the full last dim (seg == row width).
    m_ref is given -> (width, width) block-diagonal 0/1 mask: segmented
                      reduction for the lane-dense folded small-H path.
    """
    x = x_ref[...].astype(jnp.float32)
    inv = 1.0 / seg
    if m_ref is None:
        mean = jnp.sum(x, axis=-1, keepdims=True) * inv
    else:
        m = m_ref[...]
        mean = jnp.dot(x, m, preferred_element_type=jnp.float32,
                       precision=jax.lax.Precision.HIGHEST) * inv
    xc = x - mean
    if m_ref is None:
        var = jnp.sum(xc * xc, axis=-1, keepdims=True) * inv
    else:
        var = jnp.dot(xc * xc, m_ref[...], preferred_element_type=jnp.float32,
                      precision=jax.lax.Precision.HIGHEST) * inv
    y = xc * jax.lax.rsqrt(var + eps)
    if w_ref is not None:
        y = y * w_ref[...].astype(jnp.float32) + b_ref[...].astype(jnp.float32)
    o_ref[...] = y.astype(o_ref.dtype)


def _ln_kernel(x_ref, o_ref, *, eps, seg):
    _ln_body(x_ref, None, None, None, o_ref, eps, seg)


def _ln_affine_kernel(x_ref, w_ref, b_ref, o_ref, *, eps, seg):
    _ln_body(x_ref, None, w_ref, b_ref, o_ref, eps, seg)


def _ln_folded_kernel(x_ref, m_ref, o_ref, *, eps, seg):
    _ln_body(x_ref, m_ref, None, None, o_ref, eps, seg)


def _ln_folded_affine_kernel(x_ref, m_ref, w_ref, b_ref, o_ref, *, eps, seg):
    _ln_body(x_ref, m_ref, w_ref, b_ref, o_ref, eps, seg)


def fused_layer_norm(x, normalized_shape, weight=None, bias=None,
                     eps=1e-5, *, row_tile=None):
    """Forward pass of FusedLayerNorm.

    x: array whose trailing dims equal `normalized_shape`.
    weight/bias: arrays of shape `normalized_shape` (or None for no affine).
    row_tile: optional override for the rows-per-grid-step tile.
    """
    if isinstance(normalized_shape, int):
        normalized_shape = (normalized_shape,)
    normalized_shape = tuple(int(d) for d in normalized_shape)
    n_norm = len(normalized_shape)
    assert x.shape[-n_norm:] == normalized_shape, (x.shape, normalized_shape)

    hidden = 1
    for d in normalized_shape:
        hidden *= d
    rows = 1
    for d in x.shape[:-n_norm]:
        rows *= d
    out_dtype = x.dtype

    affine = (weight is not None) or (bias is not None)
    if affine:
        if weight is None:
            weight = jnp.ones(normalized_shape, dtype=x.dtype)
        if bias is None:
            bias = jnp.zeros(normalized_shape, dtype=x.dtype)
        w2d = weight.reshape(1, hidden)
        b2d = bias.reshape(1, hidden)

    x2d = x.reshape(rows, hidden)

    # Lane-dense fold for small hidden (e.g. H=32): pack 128//H rows into one
    # 128-lane row (pure row-major metadata reshape, no HBM copy).  Padded edge
    # rows occupy whole segments, so their garbage statistics never mix with
    # valid rows and are masked on the write-back.
    fold = 1
    if hidden < _LANE and _LANE % hidden == 0:
        k = _LANE // hidden
        if rows % k == 0 and rows >= k:
            fold = k
    # TODO(synk): hidden < 128 with 128 % hidden != 0 (or rows % fold != 0)
    # still uses the plain path with masked partial stores.

    if fold > 1:
        width = hidden * fold            # == 128
        rows_k = rows // fold
        x2d = x2d.reshape(rows_k, width)
        if affine:
            w2d = jnp.tile(w2d, (1, fold))
            b2d = jnp.tile(b2d, (1, fold))
        seg_i = jnp.arange(width, dtype=jnp.int32) // hidden
        seg_mask = (seg_i[:, None] == seg_i[None, :]).astype(jnp.float32)
    else:
        width = hidden
        rows_k = rows
        seg_mask = None

    vmem_budget, vmem_limit = _vmem_caps()
    align = _sublane_align(x.dtype, out_dtype)
    if row_tile is None:
        tr = _choose_row_tile(rows_k, width, x.dtype, out_dtype, vmem_budget)
    else:
        tr = max((int(row_tile) // align) * align, align)
        tr = min(tr, rows_k)

    # Ragged row counts: cdiv grid; Pallas pads the edge-block reads and masks
    # its writes, and each row's statistics only depend on that row (segment).
    grid = (pl.cdiv(rows_k, tr),)

    in_specs = [pl.BlockSpec((tr, width), lambda i: (i, 0))]
    args = [x2d]
    if seg_mask is not None:
        in_specs.append(pl.BlockSpec((width, width), lambda i: (0, 0)))
        args.append(seg_mask)
    if affine:
        in_specs.append(pl.BlockSpec((1, width), lambda i: (0, 0)))
        in_specs.append(pl.BlockSpec((1, width), lambda i: (0, 0)))
        args.extend([w2d, b2d])

    if seg_mask is not None and affine:
        kernel = functools.partial(_ln_folded_affine_kernel, eps=eps, seg=hidden)
    elif seg_mask is not None:
        kernel = functools.partial(_ln_folded_kernel, eps=eps, seg=hidden)
    elif affine:
        kernel = functools.partial(_ln_affine_kernel, eps=eps, seg=hidden)
    else:
        kernel = functools.partial(_ln_kernel, eps=eps, seg=hidden)

    # TODO(synk): if a bundle dump shows a single-core serial loop on v7x,
    # switch the row axis to pltpu.CORE_PARALLEL.
    compiler_params = pltpu.CompilerParams(
        dimension_semantics=("parallel",),
        vmem_limit_bytes=int(vmem_limit),
    )

    out2d = pl.pallas_call(
        kernel,
        out_shape=jax.ShapeDtypeStruct((rows_k, width), out_dtype),
        grid_spec=pltpu.PrefetchScalarGridSpec(
            num_scalar_prefetch=0,
            grid=grid,
            in_specs=in_specs,
            out_specs=pl.BlockSpec((tr, width), lambda i: (i, 0)),
        ),
        compiler_params=compiler_params,
    )(*args)

    return out2d.reshape(x.shape)


class FusedLayerNormJAX:
    """Mirror of the PyTorch FusedLayerNorm module (forward only)."""

    def __init__(self, normalized_shape, eps=1e-5, elementwise_affine=True):
        if isinstance(normalized_shape, int):
            normalized_shape = (normalized_shape,)
        self.normalized_shape = tuple(normalized_shape)
        self.eps = eps
        self.elementwise_affine = elementwise_affine
        if elementwise_affine:
            # reset_parameters(): weight = ones, bias = zeros
            self.weight = jnp.ones(self.normalized_shape, dtype=jnp.float32)
            self.bias = jnp.zeros(self.normalized_shape, dtype=jnp.float32)
        else:
            self.weight = None
            self.bias = None

    def __call__(self, x):
        return fused_layer_norm(x, self.normalized_shape, self.weight,
                                self.bias, self.eps)


def _reference_layer_norm(x, normalized_shape, weight, bias, eps):
    n = len(normalized_shape)
    axes = tuple(range(x.ndim - n, x.ndim))
    xf = x.astype(jnp.float32)
    mean = jnp.mean(xf, axis=axes, keepdims=True)
    var = jnp.mean((xf - mean) ** 2, axis=axes, keepdims=True)
    y = (xf - mean) * jax.lax.rsqrt(var + eps)
    if weight is not None:
        y = y * weight.astype(jnp.float32) + bias.astype(jnp.float32)
    return y.astype(x.dtype)


if __name__ == "__main__":
    key = jax.random.PRNGKey(0)
    k0, kw, kb, k1, kw2, kb2 = jax.random.split(key, 6)
    batch, seq, hidden = 2, 8, 32
    x = jax.random.normal(k0, (batch, seq, hidden), dtype=jnp.float32)

    # --- affine path, small H (exercises the folded lane-dense path) --------
    m = FusedLayerNormJAX(hidden, eps=1e-5, elementwise_affine=True)
    m.weight = 1.0 + 0.1 * jax.random.normal(kw, (hidden,), dtype=jnp.float32)
    m.bias = 0.1 * jax.random.normal(kb, (hidden,), dtype=jnp.float32)
    y = jax.block_until_ready(m(x))
    y_ref = _reference_layer_norm(x, (hidden,), m.weight, m.bias, 1e-5)
    assert y.shape == x.shape and y.dtype == x.dtype
    assert jnp.allclose(y, y_ref, atol=2e-5, rtol=2e-5)

    # --- non-affine path, small H -------------------------------------------
    m2 = FusedLayerNormJAX(hidden, eps=1e-5, elementwise_affine=False)
    y2 = jax.block_until_ready(m2(x))
    y2_ref = _reference_layer_norm(x, (hidden,), None, None, 1e-5)
    assert y2.shape == x.shape and y2.dtype == x.dtype
    assert jnp.allclose(y2, y2_ref, atol=2e-5, rtol=2e-5)

    # --- affine path, H multiple of 128 (plain lane-dense path) -------------
    hidden2 = 256
    x3 = jax.random.normal(k1, (batch, seq, hidden2), dtype=jnp.float32)
    m3 = FusedLayerNormJAX(hidden2, eps=1e-5, elementwise_affine=True)
    m3.weight = 1.0 + 0.1 * jax.random.normal(kw2, (hidden2,), dtype=jnp.float32)
    m3.bias = 0.1 * jax.random.normal(kb2, (hidden2,), dtype=jnp.float32)
    y3 = jax.block_until_ready(m3(x3))
    y3_ref = _reference_layer_norm(x3, (hidden2,), m3.weight, m3.bias, 1e-5)
    assert y3.shape == x3.shape and y3.dtype == x3.dtype
    assert jnp.allclose(y3, y3_ref, atol=2e-5, rtol=2e-5)

    # --- multi-dim normalized_shape ------------------------------------------
    x4 = x.reshape(batch, seq, 2, 16)
    m4 = FusedLayerNormJAX((2, 16), eps=1e-5, elementwise_affine=True)
    m4.weight = m.weight.reshape(2, 16)
    m4.bias = m.bias.reshape(2, 16)
    y4 = jax.block_until_ready(m4(x4))
    y4_ref = _reference_layer_norm(x4, (2, 16), m4.weight, m4.bias, 1e-5)
    assert y4.shape == x4.shape and y4.dtype == x4.dtype
    assert jnp.allclose(y4, y4_ref, atol=2e-5, rtol=2e-5)

    print("KERNEL_OK")
</pallas_src>

<mosaic_0001>
module attributes {stable_mosaic.version = 11 : i64} {
  func.func @_ln_folded_affine_kernel(%arg0: i32, %arg1: memref<4x128xf32, #tpu.memory_space<vmem>>, %arg2: memref<128x128xf32, #tpu.memory_space<vmem>>, %arg3: memref<1x128xf32, #tpu.memory_space<vmem>>, %arg4: memref<1x128xf32, #tpu.memory_space<vmem>>, %arg5: memref<4x128xf32, #tpu.memory_space<vmem>>) attributes {dimension_semantics = [#tpu.dimension_semantics<parallel>], iteration_bounds = array<i64: 1>, scalar_prefetch = 0 : i64, scratch_operands = 0 : i64, tpu.core_type = #tpu.core_type<tc>, window_params = [{transform_indices = @transform_0, window_bounds = array<i64: 4, 128>}, {pipeline_mode = #tpu.pipeline_mode<synchronous>, transform_indices = @transform_1, window_bounds = array<i64: 128, 128>}, {pipeline_mode = #tpu.pipeline_mode<synchronous>, transform_indices = @transform_2, window_bounds = array<i64: 1, 128>}, {pipeline_mode = #tpu.pipeline_mode<synchronous>, transform_indices = @transform_3, window_bounds = array<i64: 1, 128>}, {transform_indices = @transform_4, window_bounds = array<i64: 4, 128>}]} {
    %c0 = arith.constant 0 : index
    %c0_0 = arith.constant 0 : index
    %0 = vector.load %arg1[%c0, %c0_0] : memref<4x128xf32, #tpu.memory_space<vmem>>, vector<4x128xf32>
    %c0_1 = arith.constant 0 : index
    %c0_2 = arith.constant 0 : index
    %1 = vector.load %arg2[%c0_1, %c0_2] : memref<128x128xf32, #tpu.memory_space<vmem>>, vector<128x128xf32>
    %cst = arith.constant dense<0.000000e+00> : vector<4x128xf32>
    %2 = tpu.matmul %0, %1, %cst {dimension_numbers = #tpu.dot_dimension_numbers<[1], [0], [0], [1], [0, 0, 1, 1], [], []>, precision = #tpu.contract_precision<fp32>} : vector<4x128xf32>, vector<128x128xf32>, vector<4x128xf32> -> vector<4x128xf32>
    %cst_3 = arith.constant 3.125000e-02 : f32
    %3 = vector.broadcast %cst_3 : f32 to vector<4x128xf32>
    %4 = arith.mulf %2, %3 : vector<4x128xf32>
    %5 = arith.subf %0, %4 : vector<4x128xf32>
    %6 = arith.mulf %5, %5 : vector<4x128xf32>
    %c0_4 = arith.constant 0 : index
    %c0_5 = arith.constant 0 : index
    %7 = vector.load %arg2[%c0_4, %c0_5] : memref<128x128xf32, #tpu.memory_space<vmem>>, vector<128x128xf32>
    %cst_6 = arith.constant dense<0.000000e+00> : vector<4x128xf32>
    %8 = tpu.matmul %6, %7, %cst_6 {dimension_numbers = #tpu.dot_dimension_numbers<[1], [0], [0], [1], [0, 0, 1, 1], [], []>, precision = #tpu.contract_precision<fp32>} : vector<4x128xf32>, vector<128x128xf32>, vector<4x128xf32> -> vector<4x128xf32>
    %cst_7 = arith.constant 3.125000e-02 : f32
    %9 = vector.broadcast %cst_7 : f32 to vector<4x128xf32>
    %10 = arith.mulf %8, %9 : vector<4x128xf32>
    %cst_8 = arith.constant 9.99999974E-6 : f32
    %11 = vector.broadcast %cst_8 : f32 to vector<4x128xf32>
    %12 = arith.addf %10, %11 : vector<4x128xf32>
    %13 = math.rsqrt %12 : vector<4x128xf32>
    %14 = arith.mulf %5, %13 : vector<4x128xf32>
    %c0_9 = arith.constant 0 : index
    %c0_10 = arith.constant 0 : index
    %15 = vector.load %arg3[%c0_9, %c0_10] : memref<1x128xf32, #tpu.memory_space<vmem>>, vector<1x128xf32>
    %16 = vector.broadcast %15 : vector<1x128xf32> to vector<4x128xf32>
    %17 = arith.mulf %14, %16 : vector<4x128xf32>
    %c0_11 = arith.constant 0 : index
    %c0_12 = arith.constant 0 : index
    %18 = vector.load %arg4[%c0_11, %c0_12] : memref<1x128xf32, #tpu.memory_space<vmem>>, vector<1x128xf32>
    %19 = vector.broadcast %18 : vector<1x128xf32> to vector<4x128xf32>
    %20 = arith.addf %17, %19 : vector<4x128xf32>
    %c0_13 = arith.constant 0 : index
    %c0_14 = arith.constant 0 : index
    %21 = vector.load %arg5[%c0_13, %c0_14] : memref<4x128xf32, #tpu.memory_space<vmem>>, vector<4x128xf32>
    tpu.vector_store %arg5[%c0_13, %c0_14], %20 {strides = array<i32>} : memref<4x128xf32, #tpu.memory_space<vmem>>, vector<4x128xf32>,
    return
  }
  func.func @transform_0(%arg0: i32) -> (i32, i32) {
    %c0_i32 = arith.constant 0 : i32
    %c0_i32_0 = arith.constant 0 : i32
    return %arg0, %c0_i32 : i32, i32
  }
  func.func @transform_1(%arg0: i32) -> (i32, i32) {
    %c0_i32 = arith.constant 0 : i32
    %c0_i32_0 = arith.constant 0 : i32
    %c0_i32_1 = arith.constant 0 : i32
    return %c0_i32, %c0_i32_0 : i32, i32
  }
  func.func @transform_2(%arg0: i32) -> (i32, i32) {
    %c0_i32 = arith.constant 0 : i32
    %c0_i32_0 = arith.constant 0 : i32
    %c0_i32_1 = arith.constant 0 : i32
    return %c0_i32, %c0_i32_0 : i32, i32
  }
  func.func @transform_3(%arg0: i32) -> (i32, i32) {
    %c0_i32 = arith.constant 0 : i32
    %c0_i32_0 = arith.constant 0 : i32
    %c0_i32_1 = arith.constant 0 : i32
    return %c0_i32, %c0_i32_0 : i32, i32
  }
  func.func @transform_4(%arg0: i32) -> (i32, i32) {
    %c0_i32 = arith.constant 0 : i32
    %c0_i32_0 = arith.constant 0 : i32
    return %arg0, %c0_i32 : i32, i32
  }
}

</mosaic_0001>

<bundles_post_ra>
// kernel: tpu_custom_call.1
= control target key start
LH: loop header
LB: loop body
LE: loop exit
PB: predicated region body
PF: predicated region fallthrough
CT: control target
= control target key end

     0   :  { %9 = vsyncpa [#allocation3], 0  ;;  %s1319_s0 = inlined_call_operand.hbm [shape: f32[4,128], index: 0, kind: input, shape index: {}]   ;;  %s1320_s1 = inlined_call_operand.hbm [shape: f32[128,128], index: 1, kind: input, shape index: {}]   ;;  %s1321_s2 = inlined_call_operand.vmem [shape: f32[1,128], index: 2, kind: input, shape index: {}]   ;;  %s1322_s3 = inlined_call_operand.vmem [shape: f32[1,128], index: 3, kind: input, shape index: {}]   ;;  %s1323_s4 = inlined_call_operand.hbm [shape: f32[4,128], index: 4, kind: output, shape index: {}]  }
   0x1   :  { %10 = vsyncpa [#allocation6], 0 }
   0x2   :  { %11 = vsyncpa [#allocation4], 0  ;;  %s17_s17 = sshll.u32 %s1319_s0, 4  ;;  %s879_s18 = smov [#allocation2]   ;;  %s18_s17 = int_to_ptr.hbm [resolvable:$true] %s17_s17 }
   0x3   :  { %s19_s19 = sshll.u32 %s879_s18, 4  ;;  %s27_s22 = sshll.u32 %s1320_s1, 4  ;;  %s20_s19 = int_to_ptr.vmem [resolvable:$true] %s19_s19  ;;  %s28_s22 = int_to_ptr.hbm [resolvable:$true] %s27_s22 }
   0x4   :  { %22 = dma.hbm_to_vmem [thread:$0]  %s18_s17, 64, %s20_s19, [#allocation3]  }
   0x5   :  { %s880_s23 = smov [#allocation5]   ;;  %s881_s25 = smov 128  }
   0x6   :  { %s29_s24 = sshll.u32 %s880_s23, 4  ;;  %s882_s26 = smov 8   ;;  %s30_s24 = int_to_ptr.vmem [resolvable:$true] %s29_s24 }
   0x7   :  { %35 = dma.hbm_to_vmem [thread:$0]  %s28_s22, 2048, %s30_s24, [#allocation6], %s881_s25, %s881_s25, %s882_s26  }
   0x8   :  { %873 = dma.done.wait [#allocation3], 64  }
   0x9   :  { %874 = vsyncadd [#allocation3], 4294967232 }
   0xa   :  { %875 = dma.done.wait [#allocation6], 2048  }
   0xb   :  { %876 = vsyncadd [#allocation6], 4294965248  ;;  %v64_v0 = vld [vmem:[#allocation5 + $0x78] sm:$0xff]  ;;  %v63_v1 = vld [vmem:[#allocation5 + $0x70] sm:$0xff]  ;;  %s883_s29 = smov [#allocation7]   ;;  %s781_s7 = sshll.u32 %s1323_s4, 4  ;;  %s782_s7 = int_to_ptr.hbm [resolvable:$true] %s781_s7 }
   0xc   :  { %v62_v2 = vld [vmem:[#allocation5 + $0x68] sm:$0xff]  ;;  %v915_v3 = vand.u32 4294901760, %v64_v0  ;;  %v917_v4 = vand.u32 4294901760, %v63_v1  ;;  %v61_v6 = vld [vmem:[#allocation5 + $0x60] sm:$0xff]  ;;  %v60_v7 = vld [vmem:[#allocation5 + $0x58] sm:$0xff]  ;;  %s779_s30 = sshll.u32 %s883_s29, 4  ;;  %s780_s30 = int_to_ptr.vmem [resolvable:$true] %s779_s30 }
   0xd   :  { %v919_v5 = vand.u32 4294901760, %v62_v2  ;;  %v59_v8 = vld [vmem:[#allocation5 + $0x50] sm:$0xff]  ;;  %v921_v9 = vand.u32 4294901760, %v61_v6  ;;  %v923_v10 = vand.u32 4294901760, %v60_v7  ;;  %v58_v12 = vld [vmem:[#allocation5 + $0x48] sm:$0xff]  ;;  %v57_v13 = vld [vmem:[#allocation5 + $0x40] sm:$0xff] }
   0xe   :  { %v925_v11 = vand.u32 4294901760, %v59_v8  ;;  %66 = vmatpush.msra.mxu0 %v915_v3  ;;  %v929_v14 = vsub.f32 %v64_v0, %v915_v3  ;;  %v932_v15 = vsub.f32 %v63_v1, %v917_v4  ;;  %v937_v17 = vand.u32 4294901760, %v58_v12  ;;  %v56_v18 = vld [vmem:[#allocation5 + $0x38] sm:$0xff]  ;;  %262 = vmatpush.msra.mxu3 %v915_v3  ;;  %v55_v26 = vld [vmem:[#allocation5 + $0x30] sm:$0xff]  ;;  %v54_v36 = vld [vmem:[#allocation5 + $0x28] sm:$0xff] }
   0xf   :  { %v935_v16 = vsub.f32 %v62_v2, %v919_v5  ;;  %v941_v19 = vsub.f32 %v61_v6, %v921_v9  ;;  %v944_v20 = vsub.f32 %v60_v7, %v923_v10  ;;  %v959_v25 = vand.u32 4294901760, %v57_v13  ;;  %v53_v42 = vld [vmem:[#allocation5 + $0x20] sm:$0xff]  ;;  %v52_v47 = vld [vmem:[#allocation5 + $0x18] sm:$0xff]  ;;  %v51_v55 = vld [vmem:[#allocation5 + $0x10] sm:$0xff] }
  0x10   :  { %v947_v21 = vsub.f32 %v59_v8, %v925_v11  ;;  %68 = vmatpush.msra.mxu0 %v917_v4  ;;  %v951_v22 = vand.u32 4294901760, %v929_v14  ;;  %v954_v23 = vand.u32 4294901760, %v932_v15  ;;  %209 = vmatpush.msra.mxu2 %v929_v14  ;;  %v965_v28 = vand.u32 4294901760, %v56_v18  ;;  %v50_v60 = vld [vmem:[#allocation5 + $0x8] sm:$0xff]  ;;  %v49_v1 = vld [vmem:[#allocation5] sm:$0xff] }
  0x11   :  { %v957_v24 = vand.u32 4294901760, %v935_v16  ;;  %v963_v27 = vand.u32 4294901760, %v941_v19  ;;  %v968_v29 = vsub.f32 %v58_v12, %v937_v17  ;;  %264 = vmatpush.msra.mxu3 %v917_v4  ;;  %v979_v33 = vand.u32 4294901760, %v944_v20  ;;  %v1069_v7 = vld [vmem:[#allocation2] sm:$0xf] }
  0x12   :  { %70 = vmatpush.msra.mxu0 %v919_v5  ;;  %v109_v30 = vsub.f32 %v929_v14, %v951_v22  ;;  %v115_v31 = vsub.f32 %v932_v15, %v954_v23  ;;  %212 = vmatpush.msra.mxu2 %v932_v15  ;;  %v983_v34 = vand.u32 4294901760, %v947_v21  ;;  %v985_v35 = vand.u32 4294901760, %v55_v26  ;;  %1338 = vst [vmem:[#allocation17_spill] sm:$0xff] %v1069_v7 }
  0x13   :  { %v121_v32 = vsub.f32 %v935_v16, %v957_v24  ;;  %266 = vmatpush.msra.mxu3 %v919_v5  ;;  %v127_v39 = vsub.f32 %v941_v19, %v963_v27  ;;  %v996_v40 = vsub.f32 %v57_v13, %v959_v25  ;;  %v1000_v41 = vand.u32 4294901760, %v968_v29 }
  0x14   :  { %v988_v37 = vand.u32 4294901760, %v109_v30  ;;  %72 = vmatpush.msra.mxu0 %v921_v9  ;;  %v991_v38 = vand.u32 4294901760, %v115_v31  ;;  %215 = vmatpush.msra.mxu2 %v935_v16  ;;  %v133_v44 = vsub.f32 %v944_v20, %v979_v33  ;;  %v1009_v45 = vand.u32 4294901760, %v54_v36 }
  0x15   :  { %1332 = vst [vmem:[#allocation11_spill] sm:$0xff] %v996_v40  ;;  %268 = vmatpush.msra.mxu3 %v921_v9  ;;  %v1005_v43 = vand.u32 4294901760, %v121_v32  ;;  %v1012_v46 = vsub.f32 %v56_v18, %v965_v28  ;;  %v139_v48 = vsub.f32 %v947_v21, %v983_v34  ;;  %v1020_v49 = vand.u32 4294901760, %v127_v39 }
  0x16   :  { %111 = vmatpush.msra.mxu1 %v988_v37  ;;  %74 = vmatpush.msra.mxu0 %v923_v10  ;;  %v1023_v50 = vand.u32 4294901760, %v996_v40  ;;  %v1025_v51 = vand.u32 4294901760, %v53_v42  ;;  %v1028_v52 = vsub.f32 %v55_v26, %v985_v35  ;;  %v145_v53 = vsub.f32 %v968_v29, %v1000_v41 }
  0x17   :  { %1333 = vst [vmem:[#allocation12_spill] sm:$0xff] %v1012_v46  ;;  %218 = vmatpush.msra.mxu2 %v941_v19  ;;  %270 = vmatpush.msra.mxu3 %v923_v10  ;;  %v1032_v54 = vand.u32 4294901760, %v52_v47  ;;  %v1038_v56 = vand.u32 4294901760, %v133_v44  ;;  %v1041_v57 = vand.u32 4294901760, %v1012_v46  ;;  %v1044_v58 = vsub.f32 %v54_v36, %v1009_v45 }
  0x18   :  { %117 = vmatpush.msra.mxu1 %v991_v38  ;;  %76 = vmatpush.msra.mxu0 %v925_v11  ;;  %1334 = vst [vmem:[#allocation13_spill] sm:$0xff] %v1028_v52  ;;  %v1046_v59 = vand.u32 4294901760, %v139_v48  ;;  %v151_v61 = vsub.f32 %v996_v40, %v1023_v50  ;;  %v1055_v62 = vand.u32 4294901760, %v1028_v52  ;;  %v1057_v63 = vand.u32 4294901760, %v51_v55 }
  0x19   :  { %221 = vmatpush.msra.mxu2 %v944_v20  ;;  %272 = vmatpush.msra.mxu3 %v925_v11  ;;  %1335 = vst [vmem:[#allocation14_spill] sm:$0xff] %v1044_v58  ;;  %v1060_v0 = vsub.f32 %v53_v42, %v1025_v51  ;;  %v1062_v2 = vand.u32 4294901760, %v145_v53  ;;  %v1065_v6 = vsub.f32 %v52_v47, %v1032_v54  ;;  %v1076_v12 = vand.u32 4294901760, %v1044_v58 }
  0x1a   :  { %123 = vmatpush.msra.mxu1 %v1005_v43  ;;  %78 = vmatpush.msra.mxu0 %v937_v17  ;;  %v157_v8 = vsub.f32 %v1012_v46, %v1041_v57  ;;  %v1078_v13 = vand.u32 4294901760, %v50_v60  ;;  %v1081_v18 = vand.u32 4294901760, %v1069_v7  ;;  %v1083_v26 = vand.u32 4294901760, %v49_v1 }
  0x1b   :  { %224 = vmatpush.msra.mxu2 %v947_v21  ;;  %274 = vmatpush.msra.mxu3 %v937_v17  ;;  %1336 = vst [vmem:[#allocation15_spill] sm:$0xff] %v1060_v0  ;;  %v1089_v30 = vand.u32 4294901760, %v151_v61  ;;  %v163_v31 = vsub.f32 %v1028_v52, %v1055_v62  ;;  %v1094_v32 = vand.u32 4294901760, %v1060_v0  ;;  %v1097_v36 = vsub.f32 %v51_v55, %v1057_v63 }
  0x1c   :  { %129 = vmatpush.msra.mxu1 %v1020_v49  ;;  %80 = vmatpush.msra.mxu0 %v959_v25  ;;  %1337 = vst [vmem:[#allocation16_spill] sm:$0xff] %v1065_v6  ;;  %v1100_v39 = vand.u32 4294901760, %v1065_v6  ;;  %v1106_v42 = vand.u32 4294901760, %v157_v8  ;;  %v169_v44 = vsub.f32 %v1044_v58, %v1076_v12  ;;  %v1111_v47 = vsub.f32 %v50_v60, %v1078_v13 }
  0x1d   :  { %227 = vmatpush.msra.mxu2 %v968_v29  ;;  %276 = vmatpush.msra.mxu3 %v959_v25  ;;  %1339 = vst [vmem:[#allocation18_spill] sm:$0xff] %v1097_v36  ;;  %v98_v48 = vsub.f32 %v1069_v7, %v1081_v18  ;;  %v1119_v53 = vand.u32 4294901760, %v163_v31  ;;  %v175_v55 = vsub.f32 %v1060_v0, %v1094_v32  ;;  %v1124_v61 = vand.u32 4294901760, %v1097_v36 }
  0x1e   :  { %135 = vmatpush.msra.mxu1 %v1038_v56  ;;  %82 = vmatpush.msra.mxu0 %v965_v28  ;;  %v1127_v60 = vsub.f32 %v49_v1, %v1083_v26  ;;  %v1133_v8 = vand.u32 4294901760, %v169_v44  ;;  %v181_v31 = vsub.f32 %v1065_v6, %v1100_v39  ;;  %v1138_v7 = vand.u32 4294901760, %v1111_v47 }
  0x1f   :  { %230 = vmatpush.msra.mxu2 %v996_v40  ;;  %278 = vmatpush.msra.mxu3 %v965_v28  ;;  %v1144_v1 = vand.u32 4294901760, %v175_v55  ;;  %v187_v44 = vsub.f32 %v1097_v36, %v1124_v61 }
  0x20   :  { %141 = vmatpush.msra.mxu1 %v1046_v59  ;;  %84 = vmatpush.msra.mxu0 %v985_v35  ;;  %v193_v55 = vsub.f32 %v1111_v47, %v1138_v7 }
  0x21   :  { %233 = vmatpush.msra.mxu2 %v1012_v46  ;;  %280 = vmatpush.msra.mxu3 %v985_v35 }
  0x22   :  { %147 = vmatpush.msra.mxu1 %v1062_v2  ;;  %86 = vmatpush.msra.mxu0 %v1009_v45 }
  0x23   :  { %236 = vmatpush.msra.mxu2 %v1028_v52  ;;  %282 = vmatpush.msra.mxu3 %v1009_v45  ;;  %v99_v52 = vand.u32 4294901760, %v98_v48 }
  0x24   :  { %153 = vmatpush.msra.mxu1 %v1089_v30  ;;  %88 = vmatpush.msra.mxu0 %v1025_v51 }
  0x25   :  { %239 = vmatpush.msra.mxu2 %v1044_v58  ;;  %284 = vmatpush.msra.mxu3 %v1025_v51  ;;  %v1149_v58 = vand.u32 4294901760, %v1127_v60  ;;  %v100_v46 = vsub.f32 %v98_v48, %v99_v52 }
  0x26   :  { %159 = vmatpush.msra.mxu1 %v1106_v42  ;;  %90 = vmatpush.msra.mxu0 %v1032_v54 }
  0x27   :  { %242 = vmatpush.msra.mxu2 %v1060_v0  ;;  %286 = vmatpush.msra.mxu3 %v1032_v54  ;;  %v1155_v0 = vand.u32 4294901760, %v181_v31  ;;  %v199_v40 = vsub.f32 %v1127_v60, %v1149_v58  ;;  %v1170_v31 = vand.u32 4294901760, %v193_v55 }
  0x28   :  { %165 = vmatpush.msra.mxu1 %v1119_v53  ;;  %92 = vmatpush.msra.mxu0 %v1057_v63 }
  0x29   :  { %245 = vmatpush.msra.mxu2 %v1065_v6  ;;  %288 = vmatpush.msra.mxu3 %v1057_v63  ;;  %v1163_v6 = vand.u32 4294901760, %v187_v44  ;;  %v1176_v44 = vand.u32 4294901760, %v199_v40 }
  0x2a   :  { %171 = vmatpush.msra.mxu1 %v1133_v8  ;;  %94 = vmatpush.msra.mxu0 %v1078_v13 }
  0x2b   :  { %248 = vmatpush.msra.mxu2 %v1097_v36  ;;  %290 = vmatpush.msra.mxu3 %v1078_v13  ;;  %v101_v36 = vand.u32 4294901760, %v100_v46 }
  0x2c   :  { %177 = vmatpush.msra.mxu1 %v1144_v1  ;;  %96 = vmatpush.msra.mxu0 %v1083_v26 }
  0x2d   :  { %251 = vmatpush.msra.mxu2 %v1111_v47  ;;  %292 = vmatpush.msra.mxu3 %v1083_v26 }
  0x2e   :  { %303 = vmatpush.msrb.mxu0 %v951_v22  ;;  %183 = vmatpush.msra.mxu1 %v1155_v0 }
  0x2f   :  { %254 = vmatpush.msra.mxu2 %v1127_v60  ;;  %296 = vmatmul.f32.vlgmr.msra.gmra.mxu3 %v99_v52 }
  0x30   :  { %307 = vmatpush.msrb.mxu0 %v954_v23  ;;  %189 = vmatpush.msra.mxu1 %v1163_v6 }
  0x31   :  { %257 = vmatmul.f32.vlgmr.msra.gmra.mxu2 %v98_v48  ;;  %102 = vmatmul.f32.vlgmr.msra.gmra.mxu0 %v101_v36 }
  0x32   :  { %311 = vmatpush.msrb.mxu0 %v957_v24  ;;  %195 = vmatpush.msra.mxu1 %v1170_v31 }
  0x33   :  { %455 = vmatpush.msrb.mxu3 %v988_v37  ;;  %410 = vmatpush.msrb.mxu2 %v915_v3 }
  0x34   :  { %315 = vmatpush.msrb.mxu0 %v963_v27  ;;  %201 = vmatpush.msra.mxu1 %v1176_v44 }
  0x35   :  { %203 = vmatmul.f32.vlgmr.msra.gmra.mxu1 %v1081_v18  ;;  %461 = vmatpush.msrb.mxu3 %v991_v38 }
  0x36   :  { %370 = vmatpush.msrb.mxu1 %v915_v3  ;;  %319 = vmatpush.msrb.mxu0 %v979_v33 }
  0x37   :  { %467 = vmatpush.msrb.mxu3 %v1005_v43  ;;  %412 = vmatpush.msrb.mxu2 %v917_v4 }
  0x38   :  { %372 = vmatpush.msrb.mxu1 %v917_v4  ;;  %323 = vmatpush.msrb.mxu0 %v983_v34 }
  0x39   :  { %473 = vmatpush.msrb.mxu3 %v1020_v49  ;;  %414 = vmatpush.msrb.mxu2 %v919_v5 }
  0x3a   :  { %374 = vmatpush.msrb.mxu1 %v919_v5  ;;  %327 = vmatpush.msrb.mxu0 %v1000_v41 }
  0x3b   :  { %479 = vmatpush.msrb.mxu3 %v1038_v56  ;;  %416 = vmatpush.msrb.mxu2 %v921_v9 }
  0x3c   :  { %376 = vmatpush.msrb.mxu1 %v921_v9  ;;  %331 = vmatpush.msrb.mxu0 %v1023_v50 }
  0x3d   :  { %485 = vmatpush.msrb.mxu3 %v1046_v59  ;;  %418 = vmatpush.msrb.mxu2 %v923_v10 }
  0x3e   :  { %378 = vmatpush.msrb.mxu1 %v923_v10  ;;  %335 = vmatpush.msrb.mxu0 %v1041_v57 }
  0x3f   :  { %491 = vmatpush.msrb.mxu3 %v1062_v2  ;;  %420 = vmatpush.msrb.mxu2 %v925_v11 }
  0x40   :  { %380 = vmatpush.msrb.mxu1 %v925_v11  ;;  %339 = vmatpush.msrb.mxu0 %v1055_v62 }
  0x41   :  { %497 = vmatpush.msrb.mxu3 %v1089_v30  ;;  %422 = vmatpush.msrb.mxu2 %v937_v17  ;;  %v798_v30 = vld [vmem:[%s1322_s3] ss:$0 sm:$0xff] }
  0x42   :  { %382 = vmatpush.msrb.mxu1 %v937_v17  ;;  %343 = vmatpush.msrb.mxu0 %v1076_v12 }
  0x43   :  { %503 = vmatpush.msrb.mxu3 %v1106_v42  ;;  %424 = vmatpush.msrb.mxu2 %v959_v25 }
  0x44   :  { %384 = vmatpush.msrb.mxu1 %v959_v25  ;;  %347 = vmatpush.msrb.mxu0 %v1094_v32 }
  0x45   :  { %509 = vmatpush.msrb.mxu3 %v1119_v53  ;;  %426 = vmatpush.msrb.mxu2 %v965_v28 }
  0x46   :  { %386 = vmatpush.msrb.mxu1 %v965_v28  ;;  %351 = vmatpush.msrb.mxu0 %v1100_v39 }
  0x47   :  { %515 = vmatpush.msrb.mxu3 %v1133_v8  ;;  %428 = vmatpush.msrb.mxu2 %v985_v35 }
  0x48   :  { %388 = vmatpush.msrb.mxu1 %v985_v35  ;;  %355 = vmatpush.msrb.mxu0 %v1124_v61 }
  0x49   :  { %521 = vmatpush.msrb.mxu3 %v1144_v1  ;;  %430 = vmatpush.msrb.mxu2 %v1009_v45 }
  0x4a   :  { %390 = vmatpush.msrb.mxu1 %v1009_v45  ;;  %359 = vmatpush.msrb.mxu0 %v1138_v7 }
  0x4b   :  { %527 = vmatpush.msrb.mxu3 %v1155_v0  ;;  %432 = vmatpush.msrb.mxu2 %v1025_v51 }
  0x4c   :  { %392 = vmatpush.msrb.mxu1 %v1025_v51  ;;  %363 = vmatpush.msrb.mxu0 %v1149_v58 }
  0x4d   :  { %365 = vmatmul.f32.vlgmr.msrb.gmra.mxu0 %v1081_v18  ;;  %533 = vmatpush.msrb.mxu3 %v1163_v6 }
  0x4e   :  { %394 = vmatpush.msrb.mxu1 %v1032_v54  ;;  %553 = vmatpush.msra.mxu0 %v929_v14  ;;  %v1346_v14 = vld [vmem:[#allocation18_spill] sm:$0xff] }
  0x4f   :  { %539 = vmatpush.msrb.mxu3 %v1170_v31  ;;  %434 = vmatpush.msrb.mxu2 %v1032_v54 }
  0x50   :  { %396 = vmatpush.msrb.mxu1 %v1057_v63  ;;  %556 = vmatpush.msra.mxu0 %v932_v15 }
  0x51   :  { %545 = vmatpush.msrb.mxu3 %v1176_v44  ;;  %436 = vmatpush.msrb.mxu2 %v1057_v63 }
  0x52   :  { %398 = vmatpush.msrb.mxu1 %v1078_v13  ;;  %559 = vmatpush.msra.mxu0 %v935_v16 }
  0x53   :  { %714 = vmatpush.msra.mxu3 %v915_v3  ;;  %438 = vmatpush.msrb.mxu2 %v1078_v13 }
  0x54   :  { %400 = vmatpush.msrb.mxu1 %v1083_v26  ;;  %562 = vmatpush.msra.mxu0 %v941_v19 }
  0x55   :  { %402 = vmatmul.f32.vlgmr.msrb.gmra.mxu1 %v1081_v18  ;;  %716 = vmatpush.msra.mxu3 %v917_v4 }
  0x56   :  { %606 = vmatpush.msra.mxu1 %v915_v3  ;;  %565 = vmatpush.msra.mxu0 %v944_v20  ;;  %v1340_v3 = vld [vmem:[#allocation11_spill] sm:$0xff] }
  0x57   :  { %718 = vmatpush.msra.mxu3 %v919_v5  ;;  %440 = vmatpush.msrb.mxu2 %v1083_v26 }
  0x58   :  { %608 = vmatpush.msra.mxu1 %v917_v4  ;;  %568 = vmatpush.msra.mxu0 %v947_v21  ;;  %v1341_v4 = vld [vmem:[#allocation12_spill] sm:$0xff] }
  0x59   :  { %720 = vmatpush.msra.mxu3 %v921_v9  ;;  %647 = vmatpush.msra.mxu2 %v951_v22 }
  0x5a   :  { %610 = vmatpush.msra.mxu1 %v919_v5  ;;  %571 = vmatpush.msra.mxu0 %v968_v29  ;;  %v1342_v5 = vld [vmem:[#allocation13_spill] sm:$0xff] }
  0x5b   :  { %722 = vmatpush.msra.mxu3 %v923_v10  ;;  %651 = vmatpush.msra.mxu2 %v954_v23  ;;  %v1347_v29 = vld [vmem:[#allocation17_spill] sm:$0xff] }
  0x5c   :  { %612 = vmatpush.msra.mxu1 %v921_v9  ;;  %574 = vmatpush.msra.mxu0 %v1340_v3  ;;  %v1343_v9 = vld [vmem:[#allocation14_spill] sm:$0xff] }
  0x5d   :  { %724 = vmatpush.msra.mxu3 %v925_v11  ;;  %655 = vmatpush.msra.mxu2 %v957_v24 }
  0x5e   :  { %614 = vmatpush.msra.mxu1 %v923_v10  ;;  %577 = vmatpush.msra.mxu0 %v1341_v4  ;;  %v1344_v10 = vld [vmem:[#allocation15_spill] sm:$0xff] }
  0x5f   :  { %726 = vmatpush.msra.mxu3 %v937_v17  ;;  %659 = vmatpush.msra.mxu2 %v963_v27 }
  0x60   :  { %616 = vmatpush.msra.mxu1 %v925_v11  ;;  %580 = vmatpush.msra.mxu0 %v1342_v5  ;;  %v1345_v11 = vld [vmem:[#allocation16_spill] sm:$0xff] }
  0x61   :  { %728 = vmatpush.msra.mxu3 %v959_v25  ;;  %663 = vmatpush.msra.mxu2 %v979_v33 }
  0x62   :  { %618 = vmatpush.msra.mxu1 %v937_v17  ;;  %583 = vmatpush.msra.mxu0 %v1343_v9 }
  0x63   :  { %730 = vmatpush.msra.mxu3 %v965_v28  ;;  %667 = vmatpush.msra.mxu2 %v983_v34 }
  0x64   :  { %620 = vmatpush.msra.mxu1 %v959_v25  ;;  %586 = vmatpush.msra.mxu0 %v1344_v10 }
  0x65   :  { %732 = vmatpush.msra.mxu3 %v985_v35  ;;  %671 = vmatpush.msra.mxu2 %v1000_v41 }
  0x66   :  { %622 = vmatpush.msra.mxu1 %v965_v28  ;;  %589 = vmatpush.msra.mxu0 %v1345_v11 }
  0x67   :  { %734 = vmatpush.msra.mxu3 %v1009_v45  ;;  %675 = vmatpush.msra.mxu2 %v1023_v50 }
  0x68   :  { %624 = vmatpush.msra.mxu1 %v985_v35  ;;  %592 = vmatpush.msra.mxu0 %v1346_v14 }
  0x69   :  { %736 = vmatpush.msra.mxu3 %v1025_v51  ;;  %679 = vmatpush.msra.mxu2 %v1041_v57 }
  0x6a   :  { %626 = vmatpush.msra.mxu1 %v1009_v45  ;;  %595 = vmatpush.msra.mxu0 %v1111_v47 }
  0x6b   :  { %738 = vmatpush.msra.mxu3 %v1032_v54  ;;  %683 = vmatpush.msra.mxu2 %v1055_v62 }
  0x6c   :  { %628 = vmatpush.msra.mxu1 %v1025_v51  ;;  %598 = vmatpush.msra.mxu0 %v1127_v60 }
  0x6d   :  { %740 = vmatpush.msra.mxu3 %v1057_v63  ;;  %687 = vmatpush.msra.mxu2 %v1076_v12 }
  0x6e   :  { %630 = vmatpush.msra.mxu1 %v1032_v54 }
  0x6f   :  { %742 = vmatpush.msra.mxu3 %v1078_v13  ;;  %691 = vmatpush.msra.mxu2 %v1094_v32 }
  0x70   :  { %632 = vmatpush.msra.mxu1 %v1057_v63 }
  0x71   :  { %744 = vmatpush.msra.mxu3 %v1083_v26  ;;  %695 = vmatpush.msra.mxu2 %v1100_v39 }
  0x72   :  { %634 = vmatpush.msra.mxu1 %v1078_v13  ;;  %v797_v13 = vld [vmem:[%s1321_s2] ss:$0 sm:$0xff] }
  0x73   :  { %699 = vmatpush.msra.mxu2 %v1124_v61 }
  0x74   :  { %636 = vmatpush.msra.mxu1 %v1083_v26 }
  0x75   :  { %703 = vmatpush.msra.mxu2 %v1138_v7 }
  0x77   :  { %707 = vmatpush.msra.mxu2 %v1149_v58 }
  0xae   :  { %v103_v16 = vpop.f32.mrf.mxu0 }
  0xb2   :  { %v204_v15 = vpop.f32.mrf.mxu1  ;;  %v297_v21 = vpop.f32.mrf.mxu3 }
  0xb3   :  { %v205_v17 = vadd.f32 %v204_v15, %v103_v16 }
  0xb4   :  { %v258_v19 = vpop.f32.mrf.mxu2 }
  0xb5   :  { %v259_v20 = vadd.f32 %v258_v19, %v205_v17 }
  0xb7   :  { %v298_v22 = vadd.f32 %v297_v21, %v259_v20 }
  0xca   :  { %v366_v23 = vpop.f32.mrf.mxu0 }
  0xcb   :  { %v367_v24 = vadd.f32 %v366_v23, %v298_v22 }
  0xd2   :  { %v403_v25 = vpop.f32.mrf.mxu1 }
  0xd3   :  { %v404_v27 = vadd.f32 %v403_v25, %v367_v24 }
  0xd5   :  { %v406_v28 = vmul.f32 0.03125, %v404_v27 }
  0xd7   :  { %v407_v33 = vsub.f32 %v1347_v29, %v406_v28 }
  0xd9   :  { %v408_v34 = vmul.f32 %v407_v33, %v407_v33 }
  0xdb   :  { %v441_v35 = vand.u32 4294901760, %v408_v34 }
  0xdd   :  { %v442_v37 = vsub.f32 %v408_v34, %v441_v35  ;;  %547 = vmatmul.f32.vlgmr.msrb.gmra.mxu3 %v441_v35 }
  0xdf   :  { %601 = vmatmul.f32.vlgmr.msra.gmra.mxu0 %v442_v37  ;;  %v443_v38 = vand.u32 4294901760, %v442_v37 }
  0xe1   :  { %640 = vmatmul.f32.vlgmr.msra.gmra.mxu1 %v443_v38  ;;  %v444_v40 = vsub.f32 %v442_v37, %v443_v38 }
  0xe3   :  { %v445_v41 = vand.u32 4294901760, %v444_v40 }
  0xe5   :  { %446 = vmatmul.f32.vlgmr.msrb.gmra.mxu2 %v445_v41  ;;  %746 = vmatmul.f32.vlgmr.msra.gmra.mxu3 %v441_v35 }
  0xed   :  { %709 = vmatmul.f32.vlgmr.msra.gmra.mxu2 %v441_v35 }
 0x15c   :  { %v602_v49 = vpop.f32.mrf.mxu0 }
 0x15e   :  { %v641_v51 = vpop.f32.mrf.mxu1 }
 0x160   :  { %v548_v43 = vpop.f32.mrf.mxu3 }
 0x168   :  { %v447_v45 = vpop.f32.mrf.mxu2  ;;  %v747_v57 = vpop.f32.mrf.mxu3 }
 0x169   :  { %v549_v46 = vadd.f32 %v548_v43, %v447_v45 }
 0x16b   :  { %v603_v50 = vadd.f32 %v602_v49, %v549_v46 }
 0x16d   :  { %v642_v52 = vadd.f32 %v641_v51, %v603_v50 }
 0x170   :  { %v710_v54 = vpop.f32.mrf.mxu2 }
 0x171   :  { %v711_v56 = vadd.f32 %v710_v54, %v642_v52 }
 0x173   :  { %v748_v58 = vadd.f32 %v747_v57, %v711_v56 }
 0x175   :  { %v750_v59 = vmul.f32 0.03125, %v748_v58 }
 0x177   :  { %v751_v62 = vadd.f32 1e-05, %v750_v59 }
 0x179   :  { %799 = vrsqrt.f32 %v751_v62  ;;  %vm758_vm1 = vweird.f32 %v751_v62 }
 0x17f   :  { %v800_v63 = vpop.eup %799 }
 0x180   :  { %v753_v0 = vmul.f32 %v800_v63, %v751_v62  ;;  %vm759_vm0 = vweird.f32 %v800_v63 }
 0x181   :  { %vm760_vm2 = vmor %vm758_vm1, %vm759_vm0 }
 0x182   :  { %v754_v2 = vmul.f32 %v800_v63, %v753_v0 }
 0x184   :  { %v755_v6 = vmul.f32 0.5, %v754_v2 }
 0x186   :  { %v756_v7 = vsub.f32 1.5, %v755_v6 }
 0x188   :  { %v757_v12 = vmul.f32 %v800_v63, %v756_v7 }
 0x18a   :  { %v761_v18 = vsel %vm760_vm2, %v800_v63, %v757_v12 }
 0x18b   :  { %v762_v26 = vmul.f32 %v761_v18, %v407_v33 }
 0x18d   :  { %v767_v32 = vmul.f32 %v797_v13, %v762_v26 }
 0x18f   :  { %v772_v36 = vadd.f32 %v798_v30, %v767_v32 }
 0x191   :  { %773 = vst [vmem:[#allocation7] sm:$0xf] %v772_v36 }
 0x192   :  { %784 = dma.vmem_to_hbm [thread:$0]  %s780_s30, 64, %s782_s7, [#allocation4]  }
 0x193   :  { %877 = dma.done.wait [#allocation4], 64  }
 0x194   :  { %878 = vsyncadd [#allocation4], 4294967232 }
 0x195   :  { %789 = vsyncpa [#allocation3], 1 }
 0x196   :  { %790 = vsyncpa [#allocation6], 1 }
 0x197   :  { %791 = vsyncpa [#allocation4], 1 }

</bundles_post_ra>
